<compile_context>
chip_gen: v7x
topology: tpu7x:2x2x1
jax: 0.10.0
libtpu: 0.0.40
codegen_flags: <defaults>
</compile_context>

<pallas_src>
import functools

import jax
import jax.numpy as jnp
import numpy as np
from jax.experimental import pallas as pl
from jax.experimental.pallas import tpu as pltpu

NUM_HIDDEN_LAYERS = 2
INPUT_SIZE = 2          # forward() uses x[:, 0] and x[:, 1]
HIDDEN_SIZE = 32
BATCH = 128             # TILE == BATCH  ->  single grid step


def _net_kernel(xT_ref, win_ref, bin_ref, wh_ref, bh_ref, wout_ref, bout_ref,
                o_ref, *, num_hidden_layers, input_size):
    """One batch tile, feature-major: activations are (H, TILE)."""
    xT = xT_ref[...]                                   # (IN, TILE) f32
    hid = win_ref.shape[0]
    tile = xT.shape[1]

    # --- input layer on the VPU (K = input_size is tiny) -------------------
    w_in = win_ref[...]                                # (H, IN)
    z = jnp.zeros((hid, tile), jnp.float32) + bin_ref[...]   # (H, TILE)
    for k in range(input_size):                        # static, 2 broadcast FMAs
        z = z + w_in[:, k:k + 1] * xT[k:k + 1, :]
    h = z * jnp.tanh(z)                                # (H, TILE), lane-dense

    # --- hidden layers: (H,H) @ (H,TILE) on the MXU (static unroll) --------
    for i in range(num_hidden_layers):
        zi = jnp.dot(wh_ref[i], h, preferred_element_type=jnp.float32)
        zi = zi + bh_ref[i]                            # (H, TILE) + (H, 1)
        h = zi * jnp.tanh(zi)

    # --- output layer (N = 1) as VPU multiply + XLU sublane-reduce ---------
    out_nn = jnp.sum(wout_ref[...] * h, axis=0, keepdims=True)   # (1, TILE)
    out_nn = out_nn + bout_ref[...]                    # (1, TILE)

    # --- xs = x[:,0] * sin(pi * x[:,1]);  out = xs * out_NN ----------------
    xs = xT[0:1, :] * jnp.sin(jnp.float32(np.pi) * xT[1:2, :])   # (1, TILE)
    o_ref[...] = xs * out_nn                           # lane-dense store


def net_forward(x, w_in, b_in, w_hid, b_hid, w_out, b_out, *, tile=None):
    """x: (N, INPUT_SIZE) f32 -> (N, 1) f32.

    Weight layouts (PyTorch-style):
      w_in  (H, IN),  b_in  (H, 1)
      w_hid (L, H, H), b_hid (L, H, 1)
      w_out (H, 1)   (= output_layer.weight.T), b_out (1, 1)
    """
    n, in_dim = x.shape
    hid = w_in.shape[0]
    nl = w_hid.shape[0]

    if tile is None:
        tile = n if n <= 1024 else 1024   # single grid step at demo size
    assert n % tile == 0, "batch must be a multiple of the tile size"
    assert tile % 128 == 0 or tile == n, "tile must be lane-aligned"

    x_t = x.T                                             # (IN, N), tiny XLA op

    kernel = functools.partial(_net_kernel,
                               num_hidden_layers=nl, input_size=in_dim)

    out_rows = pl.pallas_call(
        kernel,
        out_shape=jax.ShapeDtypeStruct((n // tile, tile), jnp.float32),
        grid_spec=pltpu.PrefetchScalarGridSpec(
            num_scalar_prefetch=0,
            grid=(n // tile,),
            in_specs=[
                pl.BlockSpec((in_dim, tile), lambda i: (0, i)),     # x^T tile
                pl.BlockSpec((hid, in_dim), lambda i: (0, 0)),      # W_in
                pl.BlockSpec((hid, 1), lambda i: (0, 0)),           # b_in
                pl.BlockSpec((nl, hid, hid), lambda i: (0, 0, 0)),  # W_hid stack
                pl.BlockSpec((nl, hid, 1), lambda i: (0, 0, 0)),    # b_hid stack
                pl.BlockSpec((hid, 1), lambda i: (0, 0)),           # W_out (col)
                pl.BlockSpec((1, 1), lambda i: (0, 0)),             # b_out
            ],
            out_specs=pl.BlockSpec((1, tile), lambda i: (i, 0)),    # lane-dense
        ),
        compiler_params=pltpu.CompilerParams(
            dimension_semantics=("parallel",)),
    )(x_t, w_in, b_in, w_hid, b_hid, w_out, b_out)

    return out_rows.reshape(n, 1)


def _reference_forward(x, w_in, b_in, w_hid, b_hid, w_out, b_out):
    """Plain-JAX reference, mirrors the PyTorch forward exactly."""
    z = x @ w_in.T + b_in[:, 0]
    h = z * jnp.tanh(z)
    for i in range(w_hid.shape[0]):
        zi = h @ w_hid[i].T + b_hid[i][:, 0]
        h = zi * jnp.tanh(zi)
    out_nn = h @ w_out + b_out[0]                 # (N, 1)
    xs = x[:, 0] * jnp.sin(np.pi * x[:, 1])       # (N,)
    out = xs * out_nn[:, 0]
    return out.reshape(-1, 1)


def _init_params(key, num_hidden_layers, input_size, hidden_size):
    """Deterministic synthetic parameters in PyTorch (out, in) layout."""
    keys = jax.random.split(key, 3 + 2 * num_hidden_layers)
    scale = 0.1
    w_in = scale * jax.random.normal(keys[0], (hidden_size, input_size), jnp.float32)
    b_in = scale * jax.random.normal(keys[1], (hidden_size, 1), jnp.float32)
    w_hid = jnp.stack([
        scale * jax.random.normal(keys[2 + i], (hidden_size, hidden_size), jnp.float32)
        for i in range(num_hidden_layers)])
    b_hid = jnp.stack([
        scale * jax.random.normal(keys[2 + num_hidden_layers + i],
                                  (hidden_size, 1), jnp.float32)
        for i in range(num_hidden_layers)])
    w_out = scale * jax.random.normal(keys[-1], (hidden_size, 1), jnp.float32)
    b_out = jnp.zeros((1, 1), jnp.float32)
    return w_in, b_in, w_hid, b_hid, w_out, b_out


if __name__ == "__main__":
    key = jax.random.PRNGKey(0)
    k_x, k_p = jax.random.split(key)

    x = jax.random.uniform(k_x, (BATCH, INPUT_SIZE), jnp.float32)
    params = _init_params(k_p, NUM_HIDDEN_LAYERS, INPUT_SIZE, HIDDEN_SIZE)

    out = net_forward(x, *params)
    out = jax.block_until_ready(out)

    ref = _reference_forward(x, *params)
    assert out.shape == (BATCH, 1)
    np.testing.assert_allclose(np.asarray(out), np.asarray(ref),
                               rtol=1e-5, atol=1e-5)

    print("KERNEL_OK")
</pallas_src>

<mosaic_0001>
module attributes {stable_mosaic.version = 11 : i64} {
  func.func @_net_kernel(%arg0: i32, %arg1: memref<2x128xf32, #tpu.memory_space<vmem>>, %arg2: memref<32x2xf32, #tpu.memory_space<vmem>>, %arg3: memref<32x1xf32, #tpu.memory_space<vmem>>, %arg4: memref<2x32x32xf32, #tpu.memory_space<vmem>>, %arg5: memref<2x32x1xf32, #tpu.memory_space<vmem>>, %arg6: memref<32x1xf32, #tpu.memory_space<vmem>>, %arg7: memref<1x1xf32, #tpu.memory_space<vmem>>, %arg8: memref<1x128xf32, #tpu.memory_space<vmem>>) attributes {dimension_semantics = [#tpu.dimension_semantics<parallel>], iteration_bounds = array<i64: 1>, scalar_prefetch = 0 : i64, scratch_operands = 0 : i64, tpu.core_type = #tpu.core_type<tc>, window_params = [{transform_indices = @transform_0, window_bounds = array<i64: 2, 128>}, {pipeline_mode = #tpu.pipeline_mode<synchronous>, transform_indices = @transform_1, window_bounds = array<i64: 32, 2>}, {pipeline_mode = #tpu.pipeline_mode<synchronous>, transform_indices = @transform_2, window_bounds = array<i64: 32, 1>}, {pipeline_mode = #tpu.pipeline_mode<synchronous>, transform_indices = @transform_3, window_bounds = array<i64: 2, 32, 32>}, {pipeline_mode = #tpu.pipeline_mode<synchronous>, transform_indices = @transform_4, window_bounds = array<i64: 2, 32, 1>}, {pipeline_mode = #tpu.pipeline_mode<synchronous>, transform_indices = @transform_5, window_bounds = array<i64: 32, 1>}, {pipeline_mode = #tpu.pipeline_mode<synchronous>, transform_indices = @transform_6, window_bounds = array<i64: 1, 1>}, {transform_indices = @transform_7, window_bounds = array<i64: 1, 128>}]} {
    %c0 = arith.constant 0 : index
    %c0_0 = arith.constant 0 : index
    %0 = vector.load %arg1[%c0, %c0_0] : memref<2x128xf32, #tpu.memory_space<vmem>>, vector<2x128xf32>
    %c0_1 = arith.constant 0 : index
    %c0_2 = arith.constant 0 : index
    %1 = vector.load %arg2[%c0_1, %c0_2] : memref<32x2xf32, #tpu.memory_space<vmem>>, vector<32x2xf32>
    %cst = arith.constant 0.000000e+00 : f32
    %2 = vector.broadcast %cst : f32 to vector<32x128xf32>
    %c0_3 = arith.constant 0 : index
    %c0_4 = arith.constant 0 : index
    %3 = vector.load %arg3[%c0_3, %c0_4] : memref<32x1xf32, #tpu.memory_space<vmem>>, vector<32x1xf32>
    %4 = vector.broadcast %3 : vector<32x1xf32> to vector<32x128xf32>
    %5 = arith.addf %2, %4 : vector<32x128xf32>
    %6 = vector.extract_strided_slice %1 {offsets = [0, 0], sizes = [32, 1], strides = [1, 1]} : vector<32x2xf32> to vector<32x1xf32>
    %7 = vector.extract_strided_slice %0 {offsets = [0, 0], sizes = [1, 128], strides = [1, 1]} : vector<2x128xf32> to vector<1x128xf32>
    %8 = vector.broadcast %6 : vector<32x1xf32> to vector<32x128xf32>
    %9 = vector.broadcast %7 : vector<1x128xf32> to vector<32x128xf32>
    %10 = arith.mulf %8, %9 : vector<32x128xf32>
    %11 = arith.addf %5, %10 : vector<32x128xf32>
    %12 = vector.extract_strided_slice %1 {offsets = [0, 1], sizes = [32, 1], strides = [1, 1]} : vector<32x2xf32> to vector<32x1xf32>
    %13 = vector.extract_strided_slice %0 {offsets = [1, 0], sizes = [1, 128], strides = [1, 1]} : vector<2x128xf32> to vector<1x128xf32>
    %14 = vector.broadcast %12 : vector<32x1xf32> to vector<32x128xf32>
    %15 = vector.broadcast %13 : vector<1x128xf32> to vector<32x128xf32>
    %16 = arith.mulf %14, %15 : vector<32x128xf32>
    %17 = arith.addf %11, %16 : vector<32x128xf32>
    %18 = math.tanh %17 : vector<32x128xf32>
    %19 = arith.mulf %17, %18 : vector<32x128xf32>
    %c0_5 = arith.constant 0 : index
    %c0_6 = arith.constant 0 : index
    %c0_7 = arith.constant 0 : index
    %20 = vector.load %arg4[%c0_5, %c0_6, %c0_7] : memref<2x32x32xf32, #tpu.memory_space<vmem>>, vector<1x32x32xf32>
    %21 = vector.shape_cast %20 : vector<1x32x32xf32> to vector<32x32xf32>
    %cst_8 = arith.constant dense<0.000000e+00> : vector<32x128xf32>
    %22 = tpu.matmul %21, %19, %cst_8 {dimension_numbers = #tpu.dot_dimension_numbers<[1], [0], [0], [1], [0, 0, 1, 1], [], []>} : vector<32x32xf32>, vector<32x128xf32>, vector<32x128xf32> -> vector<32x128xf32>
    %c0_9 = arith.constant 0 : index
    %c0_10 = arith.constant 0 : index
    %c0_11 = arith.constant 0 : index
    %23 = vector.load %arg5[%c0_9, %c0_10, %c0_11] : memref<2x32x1xf32, #tpu.memory_space<vmem>>, vector<1x32x1xf32>
    %24 = vector.shape_cast %23 : vector<1x32x1xf32> to vector<32x1xf32>
    %25 = vector.broadcast %24 : vector<32x1xf32> to vector<32x128xf32>
    %26 = arith.addf %22, %25 : vector<32x128xf32>
    %27 = math.tanh %26 : vector<32x128xf32>
    %28 = arith.mulf %26, %27 : vector<32x128xf32>
    %c1 = arith.constant 1 : index
    %c0_12 = arith.constant 0 : index
    %c0_13 = arith.constant 0 : index
    %29 = vector.load %arg4[%c1, %c0_12, %c0_13] : memref<2x32x32xf32, #tpu.memory_space<vmem>>, vector<1x32x32xf32>
    %30 = vector.shape_cast %29 : vector<1x32x32xf32> to vector<32x32xf32>
    %cst_14 = arith.constant dense<0.000000e+00> : vector<32x128xf32>
    %31 = tpu.matmul %30, %28, %cst_14 {dimension_numbers = #tpu.dot_dimension_numbers<[1], [0], [0], [1], [0, 0, 1, 1], [], []>} : vector<32x32xf32>, vector<32x128xf32>, vector<32x128xf32> -> vector<32x128xf32>
    %c1_15 = arith.constant 1 : index
    %c0_16 = arith.constant 0 : index
    %c0_17 = arith.constant 0 : index
    %32 = vector.load %arg5[%c1_15, %c0_16, %c0_17] : memref<2x32x1xf32, #tpu.memory_space<vmem>>, vector<1x32x1xf32>
    %33 = vector.shape_cast %32 : vector<1x32x1xf32> to vector<32x1xf32>
    %34 = vector.broadcast %33 : vector<32x1xf32> to vector<32x128xf32>
    %35 = arith.addf %31, %34 : vector<32x128xf32>
    %36 = math.tanh %35 : vector<32x128xf32>
    %37 = arith.mulf %35, %36 : vector<32x128xf32>
    %c0_18 = arith.constant 0 : index
    %c0_19 = arith.constant 0 : index
    %38 = vector.load %arg6[%c0_18, %c0_19] : memref<32x1xf32, #tpu.memory_space<vmem>>, vector<32x1xf32>
    %39 = vector.broadcast %38 : vector<32x1xf32> to vector<32x128xf32>
    %40 = arith.mulf %39, %37 : vector<32x128xf32>
    %cst_20 = arith.constant dense<0.000000e+00> : vector<128xf32>
    %41 = vector.multi_reduction <add>, %40, %cst_20 [0] : vector<32x128xf32> to vector<128xf32>
    %42 = vector.shape_cast %41 : vector<128xf32> to vector<1x128xf32>
    %c0_21 = arith.constant 0 : index
    %c0_22 = arith.constant 0 : index
    %43 = vector.load %arg7[%c0_21, %c0_22] : memref<1x1xf32, #tpu.memory_space<vmem>>, vector<1x1xf32>
    %44 = vector.broadcast %43 : vector<1x1xf32> to vector<1x128xf32>
    %45 = arith.addf %42, %44 : vector<1x128xf32>
    %46 = vector.extract_strided_slice %0 {offsets = [0, 0], sizes = [1, 128], strides = [1, 1]} : vector<2x128xf32> to vector<1x128xf32>
    %47 = vector.extract_strided_slice %0 {offsets = [1, 0], sizes = [1, 128], strides = [1, 1]} : vector<2x128xf32> to vector<1x128xf32>
    %cst_23 = arith.constant 3.14159274 : f32
    %48 = vector.broadcast %cst_23 : f32 to vector<1x128xf32>
    %49 = arith.mulf %48, %47 : vector<1x128xf32>
    %50 = math.sin %49 : vector<1x128xf32>
    %51 = arith.mulf %46, %50 : vector<1x128xf32>
    %52 = arith.mulf %51, %45 : vector<1x128xf32>
    %c0_24 = arith.constant 0 : index
    %c0_25 = arith.constant 0 : index
    %53 = vector.load %arg8[%c0_24, %c0_25] : memref<1x128xf32, #tpu.memory_space<vmem>>, vector<1x128xf32>
    tpu.vector_store %arg8[%c0_24, %c0_25], %52 {strides = array<i32>} : memref<1x128xf32, #tpu.memory_space<vmem>>, vector<1x128xf32>,
    return
  }
  func.func @transform_0(%arg0: i32) -> (i32, i32) {
    %c0_i32 = arith.constant 0 : i32
    %c0_i32_0 = arith.constant 0 : i32
    return %c0_i32, %arg0 : i32, i32
  }
  func.func @transform_1(%arg0: i32) -> (i32, i32) {
    %c0_i32 = arith.constant 0 : i32
    %c0_i32_0 = arith.constant 0 : i32
    %c0_i32_1 = arith.constant 0 : i32
    return %c0_i32, %c0_i32_0 : i32, i32
  }
  func.func @transform_2(%arg0: i32) -> (i32, i32) {
    %c0_i32 = arith.constant 0 : i32
    %c0_i32_0 = arith.constant 0 : i32
    %c0_i32_1 = arith.constant 0 : i32
    return %c0_i32, %c0_i32_0 : i32, i32
  }
  func.func @transform_3(%arg0: i32) -> (i32, i32, i32) {
    %c0_i32 = arith.constant 0 : i32
    %c0_i32_0 = arith.constant 0 : i32
    %c0_i32_1 = arith.constant 0 : i32
    %c0_i32_2 = arith.constant 0 : i32
    return %c0_i32, %c0_i32_0, %c0_i32_1 : i32, i32, i32
  }
  func.func @transform_4(%arg0: i32) -> (i32, i32, i32) {
    %c0_i32 = arith.constant 0 : i32
    %c0_i32_0 = arith.constant 0 : i32
    %c0_i32_1 = arith.constant 0 : i32
    %c0_i32_2 = arith.constant 0 : i32
    return %c0_i32, %c0_i32_0, %c0_i32_1 : i32, i32, i32
  }
  func.func @transform_5(%arg0: i32) -> (i32, i32) {
    %c0_i32 = arith.constant 0 : i32
    %c0_i32_0 = arith.constant 0 : i32
    %c0_i32_1 = arith.constant 0 : i32
    return %c0_i32, %c0_i32_0 : i32, i32
  }
  func.func @transform_6(%arg0: i32) -> (i32, i32) {
    %c0_i32 = arith.constant 0 : i32
    %c0_i32_0 = arith.constant 0 : i32
    %c0_i32_1 = arith.constant 0 : i32
    return %c0_i32, %c0_i32_0 : i32, i32
  }
  func.func @transform_7(%arg0: i32) -> (i32, i32) {
    %c0_i32 = arith.constant 0 : i32
    %c0_i32_0 = arith.constant 0 : i32
    return %arg0, %c0_i32 : i32, i32
  }
}

</mosaic_0001>

<bundles_post_ra>
// kernel: tpu_custom_call.1
= control target key start
LH: loop header
LB: loop body
LE: loop exit
PB: predicated region body
PF: predicated region fallthrough
CT: control target
= control target key end

     0   :  { %s943_s0 = inlined_call_operand.vmem [shape: f32[2,128], index: 0, kind: input, shape index: {}]   ;;  %s944_s1 = inlined_call_operand.vmem [shape: f32[32,2], index: 1, kind: input, shape index: {}]   ;;  %s945_s2 = inlined_call_operand.vmem [shape: f32[32,1], index: 2, kind: input, shape index: {}]   ;;  %s946_s3 = inlined_call_operand.vmem [shape: f32[2,32,32], index: 3, kind: input, shape index: {}]   ;;  %s947_s4 = inlined_call_operand.vmem [shape: f32[2,32,1], index: 4, kind: input, shape index: {}]   ;;  %s948_s5 = inlined_call_operand.vmem [shape: f32[32,1], index: 5, kind: input, shape index: {}]   ;;  %s949_s6 = inlined_call_operand.<no memory space> [shape: f32[1,1], index: 6, kind: input, shape index: {}]   ;;  %s950_s7 = inlined_call_operand.hbm [shape: f32[1,128], index: 7, kind: output, shape index: {}]  }
   0x1   :  { %v12_v0 = vstv %s949_s6 }
   0x2   :  { %13 = vst [vmem:[#allocation2] sm:$0x1] %v12_v0 }
   0x3   :  { %v34_v1 = vld [vmem:[%s945_s2] sm:$0xff]  ;;  %v725_v3 = vmov 0   ;;  %v35_v4 = vld [vmem:[%s945_s2 + $0x8] sm:$0xff] }
   0x4   :  { %v30_v2 = vld [vmem:[%s944_s1] sm:$0xff]  ;;  %666 = vset.pattern.permute.xlu1 %v725_v3  ;;  %665 = vset.pattern.permute.xlu0 %v725_v3  ;;  %v31_v5 = vld [vmem:[%s944_s1 + $0x8] sm:$0xff] }
   0x5   :  { %40 = vperm.xlu1 %666, %v34_v1   ;;  %64 = vperm.xlu0 %665, %v30_v2  }
   0x6   :  { %14 = vsyncpa [#allocation4], 0  ;;  %v33_v6 = vld [vmem:[%s944_s1 + $0x18] sm:$0xff]  ;;  %v726_v7 = vmov 1   ;;  %v32_v8 = vld [vmem:[%s944_s1 + $0x10] sm:$0xff]  ;;  %vm158_vm0 = vcmask 261120   ;;  %v82_v25 = vlaneseq }
   0x7   :  { %v36_v9 = vld [vmem:[%s945_s2 + $0x10] sm:$0xff]  ;;  %v37_v10 = vld [vmem:[%s945_s2 + $0x18] sm:$0xff]  ;;  %v130_v11 = vld [vmem:[%s946_s3] sm:$0xff] }
   0x8   :  { %616 = vmatprep.mubr.msk.f32.mxu0 %vm158_vm0, %v130_v11  ;;  %v134_v12 = vld [vmem:[%s947_s4] sm:$0xff]  ;;  %v135_v13 = vld [vmem:[%s947_s4 + $0x8] sm:$0xff]  ;;  %v136_v14 = vld [vmem:[%s947_s4 + $0x10] sm:$0xff]  ;;  %v841_v26 = vshrl.u32 %v82_v25, 7 }
   0x9   :  { %45 = vperm.xlu1 %666, %v35_v4   ;;  %69 = vperm.xlu0 %665, %v31_v5   ;;  %v580_v15 = vld [vmem:[%s947_s4 + $0x20] sm:$0xff]  ;;  %v137_v16 = vld [vmem:[%s947_s4 + $0x18] sm:$0xff]  ;;  %v582_v17 = vld [vmem:[%s947_s4 + $0x30] sm:$0xff] }
   0xa   :  { %v581_v18 = vld [vmem:[%s947_s4 + $0x28] sm:$0xff]  ;;  %v399_v19 = vld [vmem:[%s948_s5] sm:$0xff]  ;;  %v583_v20 = vld [vmem:[%s947_s4 + $0x38] sm:$0xff]  ;;  %v84_v28 = vsub.s32 0, %v841_v26  ;;  %v112_v31 = vsub.s32 1, %v841_v26 }
   0xb   :  { %v401_v21 = vld [vmem:[%s948_s5 + $0x10] sm:$0xff]  ;;  %v400_v22 = vld [vmem:[%s948_s5 + $0x8] sm:$0xff]  ;;  %v436_v23 = vld [vmem:[#allocation2] sm:$0x1] }
   0xc   :  { %v402_v24 = vld [vmem:[%s948_s5 + $0x18] sm:$0xff]  ;;  %v847_v30 = vld [vmem:[%s943_s0] sm:$0x3] }
   0xd   :  { %667 = vset.pattern.permute.xlu1 %v726_v7  ;;  %79 = vperm.xlu0 %665, %v33_v6   ;;  %v85_v32 = vrot.slane %v847_v30, %v84_v28  ;;  %v113_v36 = vrot.slane %v847_v30, %v112_v31 }
   0xe   :  { %99 = vperm.xlu1 %667, %v31_v5  }
  0x11   :  { %669 = vset.pattern.permute.xlu0 %v726_v7 }
  0x12   :  { %668 = vset.pattern.permute.xlu1 %v725_v3  ;;  %95 = vperm.xlu0 %669, %v30_v2  }
  0x13   :  { %74 = vperm.xlu1 %668, %v32_v8  }
  0x16   :  { %103 = vperm.xlu0 %669, %v32_v8   ;;  %v133_v8 = vld [vmem:[%s946_s3 + $0x18] sm:$0xff] }
  0x17   :  { %50 = vperm.xlu1 %668, %v36_v9   ;;  %v576_v9 = vld [vmem:[%s946_s3 + $0x20] sm:$0xff] }
  0x18   :  { %630 = vmatprep.mubr.msk.f32.mxu1 %vm158_vm0, %v576_v9 }
  0x1a   :  { %672 = vset.pattern.permute.xlu0 %v725_v3 }
  0x1b   :  { %55 = vperm.xlu1 %668, %v37_v10   ;;  %145 = vperm.xlu0 %672, %v135_v13  }
  0x1f   :  { %670 = vset.pattern.permute.xlu1 %v726_v7  ;;  %276 = vperm.xlu0 %672, %v580_v15   ;;  %v132_v7 = vld [vmem:[%s946_s3 + $0x10] sm:$0xff] }
  0x20   :  { %107 = vperm.xlu1 %670, %v33_v6   ;;  %v131_v6 = vld [vmem:[%s946_s3 + $0x8] sm:$0xff] }
  0x23   :  { %286 = vperm.xlu0 %672, %v582_v17  }
  0x24   :  { %671 = vset.pattern.permute.xlu1 %v725_v3 }
  0x25   :  { %140 = vperm.xlu1 %671, %v134_v12  }
  0x27   :  { %405 = vperm.xlu0 %672, %v399_v19  }
  0x29   :  { %150 = vperm.xlu1 %671, %v136_v14  }
  0x2b   :  { %415 = vperm.xlu0 %672, %v401_v21  }
  0x2d   :  { %155 = vperm.xlu1 %671, %v137_v16  }
  0x2f   :  { %439 = vperm.xlu0 %672, %v436_v23  }
  0x31   :  { %281 = vperm.xlu1 %671, %v581_v18  }
  0x35   :  { %291 = vperm.xlu1 %671, %v583_v20  }
  0x39   :  { %410 = vperm.xlu1 %671, %v400_v22  }
  0x3d   :  { %420 = vperm.xlu1 %671, %v402_v24  }
  0x84   :  { %v41_v27 = vpop.permute.xlu1 %40  ;;  %v65_v29 = vpop.permute.xlu0 %64 }
  0x85   :  { %v86_v39 = vmul.f32 %v85_v32, %v65_v29 }
  0x87   :  { %v90_v44 = vadd.f32 %v86_v39, %v41_v27 }
  0x88   :  { %v46_v33 = vpop.permute.xlu1 %45  ;;  %v70_v34 = vpop.permute.xlu0 %69 }
  0x89   :  { %v87_v35 = vmul.f32 %v85_v32, %v70_v34 }
  0x8b   :  { %v91_v40 = vadd.f32 %v87_v35, %v46_v33  ;;  %v577_v35 = vld [vmem:[%s946_s3 + $0x28] sm:$0xff] }
  0x8c   :  { %v80_v37 = vpop.permute.xlu0 %79 }
  0x8d   :  { %v100_v38 = vpop.permute.xlu1 %99  ;;  %v89_v55 = vmul.f32 %v85_v32, %v80_v37  ;;  %v579_v37 = vld [vmem:[%s946_s3 + $0x38] sm:$0xff] }
  0x8e   :  { %v115_v41 = vmul.f32 %v113_v36, %v100_v38  ;;  %v883_v38 = vmul.f32 3.1415927, %v847_v30 }
  0x90   :  { %v119_v42 = vadd.f32 %v115_v41, %v91_v40  ;;  %v451_v39 = vand.u32 2139095040, %v883_v38  ;;  %vm450_vm8 = vcmp.lt.s32.totalorder %v883_v38, 0  ;;  %vm540_vm13 = vweird.f32 %v883_v38 }
  0x91   :  { %v96_v43 = vpop.permute.xlu0 %95 }
  0x92   :  { %v114_v45 = vmul.f32 %v113_v36, %v96_v43  ;;  %v75_v46 = vpop.permute.xlu1 %74  ;;  %673 = vtanh.f32 %v119_v42  ;;  %v452_v40 = vshrl.u32 %v451_v39, 23 }
  0x93   :  { %v88_v50 = vmul.f32 %v85_v32, %v75_v46  ;;  %v727_v46 = vmov 2102212464  }
  0x94   :  { %v118_v47 = vadd.f32 %v114_v45, %v90_v44  ;;  %v588_v41 = vadd.s32 4294967169, %v452_v40 }
  0x95   :  { %v104_v49 = vpop.permute.xlu0 %103 }
  0x96   :  { %675 = vtanh.f32 %v118_v47  ;;  %v51_v48 = vpop.permute.xlu1 %50  ;;  %v116_v52 = vmul.f32 %v113_v36, %v104_v49 }
  0x97   :  { %v92_v51 = vadd.f32 %v88_v50, %v51_v48  ;;  %v728_v48 = vmov 920167782  }
  0x99   :  { %v120_v56 = vadd.f32 %v116_v52, %v92_v51  ;;  %v448_v51 = vand.u32 2147483647, %v883_v38 }
  0x9a   :  { %v56_v53 = vpop.permute.xlu1 %55  ;;  %v146_v12 = vpop.permute.xlu0 %145 }
  0x9b   :  { %v93_v59 = vadd.f32 %v89_v55, %v56_v53  ;;  %677 = vtanh.f32 %v120_v56  ;;  %v729_v53 = vmov 1326507024   ;;  %v730_v55 = vmov 683565275  }
  0x9c   :  { %v674_v54 = vpop.eup %673  ;;  %vm914_vm9 = vcmp.le.f32.partialorder %v448_v51, 0.7853982 }
  0x9d   :  { %v127_v62 = vmul.f32 %v674_v54, %v119_v42  ;;  %v458_v42 = vadd.s32 1, %v588_v41 }
  0x9f   :  { %v108_v57 = vpop.permute.xlu1 %107  ;;  %vm459_vm1 = vcmp.gt.s32.totalorder %v458_v42, 0 }
  0xa0   :  { %v676_v58 = vpop.eup %675  ;;  %v117_v60 = vmul.f32 %v113_v36, %v108_v57  ;;  %v578_v36 = vld [vmem:[%s946_s3 + $0x30] sm:$0xff]  ;;  %v460_v43 = vsel %vm459_vm1, %v458_v42, 0  ;;  %v731_v57 = vmov 2475754826   ;;  %s733_s3 = smov [#allocation3]  }
  0xa1   :  { %v126_v61 = vmul.f32 %v676_v58, %v118_v47  ;;  %v462_v44 = vand.u32 31, %v460_v43  ;;  %v461_v50 = vshrl.u32 %v460_v43, 5  ;;  %s564_s29 = sshll.u32 %s733_s3, 4  ;;  %s565_s29 = int_to_ptr.vmem [resolvable:$true] %s564_s29 }
  0xa2   :  { %v121_v63 = vadd.f32 %v117_v60, %v93_v59  ;;  %v732_v60 = vmov 2131351028   ;;  %s701_s30 = scalar_lea.vmem %s565_s29, 16  ;;  %s705_s8 = scalar_lea.vmem %s565_s29, 32 }
  0xa3   :  { %v636_v0 = vpack.c.bf16 %v127_v62, %v126_v61  ;;  %v463_v45 = vsub.s32 32, %v462_v44  ;;  %v474_v47 = vshll.u32 %v727_v46, %v462_v44  ;;  %v477_v52 = vshll.u32 %v728_v48, %v462_v44  ;;  %p702_p0 = scmp.ne.s32.totalorder %s565_s29, %s701_s30  ;;  %p706_p1 = scmp.lt.s32.totalorder %s565_s29, %s565_s29 }
  0xa4   :  { %679 = vtanh.f32 %v121_v63  ;;  %v141_v10 = vpop.permute.xlu1 %140  ;;  %v468_v59 = vshll.u32 %v731_v57, %v462_v44  ;;  %v471_v62 = vshll.u32 %v732_v60, %v462_v44  ;;  %vm483_vm2 = vcmp.lt.s32.totalorder %v461_v50, 4  ;;  %p707_p2 = scmp.lt.s32.totalorder %s705_s8, %s701_s30 }
  0xa5   :  { %637 = vmatprep.subr.bf16.mxu0 %v636_v0  ;;  %v678_v1 = vpop.eup %677  ;;  %v475_v49 = vshrl.u32 %v728_v48, %v463_v45  ;;  %v478_v54 = vshrl.u32 %v729_v53, %v463_v45  ;;  %v466_v58 = vshrl.u32 %v731_v57, %v463_v45  ;;  %v469_v61 = vshrl.u32 %v732_v60, %v463_v45  ;;  %v277_v57 = vpop.permute.xlu0 %276 }
  0xa6   :  { %639 = vmatpush3.bf16.msra.mxu0 %v636_v0  ;;  %v128_v3 = vmul.f32 %v678_v1, %v120_v56  ;;  %v465_v56 = vshll.u32 %v730_v55, %v462_v44  ;;  %v455_v1 = vand.u32 8388607, %v448_v51  ;;  %vm480_vm3 = vcmp.lt.s32.totalorder %v461_v50, 1  ;;  %p708_p3 = por %p707_p2, %p706_p1 }
  0xa7   :  { %v476_v0 = vor.u32 %v475_v49, %v474_v47  ;;  %vm482_vm4 = vcmp.lt.s32.totalorder %v461_v50, 3  ;;  %vm481_vm5 = vcmp.lt.s32.totalorder %v461_v50, 2 }
  0xa8   :  { %v151_v11 = vpop.permute.xlu1 %150  ;;  %p709_p4 = pnand %p708_p3, %p702_p0 }
  0xa9   :  { %v287_v51 = vpop.permute.xlu0 %286 }
  0xac   :  { %v156_v17 = vpop.permute.xlu1 %155 }
  0xae   :  { %v680_v2 = vpop.eup %679 }
  0xaf   :  { %v129_v4 = vmul.f32 %v680_v2, %v121_v63  ;;  %v472_v63 = vshrl.u32 %v727_v46, %v463_v45  ;;  %v479_v2 = vor.u32 %v478_v54, %v477_v52 }
  0xb1   :  { %v640_v5 = vpack.c.bf16 %v129_v4, %v128_v3  ;;  %v467_v3 = vor.u32 %v466_v58, %v465_v56  ;;  %v470_v4 = vor.u32 %v469_v61, %v468_v59  ;;  %v282_v56 = vpop.permute.xlu1 %281 }
  0xb3   :  { %641 = vmatprep.subr.bf16.mxu0 %v640_v5  ;;  %v488_v9 = vsel %vm480_vm3, %v467_v3, %v470_v4 }
  0xb4   :  { %643 = vmatpush3.bf16.msra.mxu0 %v640_v5  ;;  %v473_v5 = vor.u32 %v472_v63, %v471_v62 }
  0xb7   :  { %617 = vmatmul.mubr.msk.f32.vlgmr.msra.gmra.mrb[0].mxu0 %vm158_vm0, %v131_v6  ;;  %v489_v6 = vsel %vm483_vm2, %v476_v0, 920167782 }
  0xb8   :  { %619 = vmatprep.mubr.msk.f32.mxu0 %vm158_vm0, %v132_v7  ;;  %v456_v7 = vor.u32 8388608, %v455_v1 }
  0xbb   :  { %620 = vmatmul.mubr.msk.f32.gmra.mrb[2].mxu0 %vm158_vm0, %v133_v8  ;;  %v493_v8 = vsel %vm483_vm2, %v479_v2, 1326507024  ;;  %v292_v2 = vpop.permute.xlu1 %291 }
 0x18a   :  { %v618_v13 = vpop.f32.mrb[0].mxu0 }
 0x18b   :  { %v243_v14 = vadd.f32 %v618_v13, %v146_v12  ;;  %v237_v15 = vpop.f32.mrb[1].mxu0  ;;  %v494_v12 = vsel %vm482_vm4, %v476_v0, %v493_v8  ;;  %v496_v13 = vshll.u32 %v456_v7, 8 }
 0x18c   :  { %v238_v16 = vadd.f32 %v237_v15, %v141_v10  ;;  %v490_v10 = vsel %vm482_vm4, %v473_v5, %v489_v6 }
 0x18d   :  { %681 = vtanh.f32 %v243_v14 }
 0x18e   :  { %683 = vtanh.f32 %v238_v16  ;;  %v621_v18 = vpop.f32.mrb[2].mxu0 }
 0x18f   :  { %v253_v19 = vadd.f32 %v621_v18, %v156_v17  ;;  %v247_v20 = vpop.f32.mrb[3].mxu0  ;;  %v464_v18 = vshrl.u32 %v730_v55, %v463_v45 }
 0x190   :  { %v248_v21 = vadd.f32 %v247_v20, %v151_v11  ;;  %v492_v11 = vsel %vm480_vm3, %v470_v4, %v473_v5 }
 0x191   :  { %685 = vtanh.f32 %v253_v19  ;;  %v495_v15 = vsel %vm481_vm5, %v492_v11, %v494_v12  ;;  %v406_v12 = vpop.permute.xlu0 %405 }
 0x192   :  { %687 = vtanh.f32 %v248_v21 }
 0x197   :  { %v682_v22 = vpop.eup %681 }
 0x198   :  { %v684_v23 = vpop.eup %683  ;;  %v261_v24 = vmul.f32 %v682_v22, %v243_v14  ;;  %v491_v14 = vsel %vm481_vm5, %v488_v9, %v490_v10  ;;  %v484_v22 = vsel %vm480_vm3, %v464_v18, %v467_v3 }
 0x199   :  { %v260_v25 = vmul.f32 %v684_v23, %v238_v16  ;;  %v897_v16 = vmul.u32.u64.low %v496_v13, %v491_v14  ;;  %v898_v17 = vmul.u32.u64.high %v496_v13, %v491_v14, %v897_v16 }
 0x19b   :  { %v686_v27 = vpop.eup %685  ;;  %v644_v29 = vpack.c.bf16 %v261_v24, %v260_v25  ;;  %v506_v25 = vadd.s32 1, %v898_v17 }
 0x19c   :  { %v688_v31 = vpop.eup %687  ;;  %v263_v32 = vmul.f32 %v686_v27, %v253_v19  ;;  %v900_v19 = vmul.u32.u64.low %v496_v13, %v495_v15  ;;  %v901_v20 = vmul.u32.u64.high %v496_v13, %v495_v15, %v900_v19  ;;  %v411_v15 = vpop.permute.xlu1 %410 }
 0x19d   :  { %v262_v33 = vmul.f32 %v688_v31, %v248_v21  ;;  %645 = vmatprep.subr.bf16.mxu1 %v644_v29  ;;  %v485_v21 = vsel %vm483_vm2, %v473_v5, 2102212464 }
 0x19e   :  { %647 = vmatpush3.bf16.msra.mxu1 %v644_v29  ;;  %v486_v23 = vsel %vm482_vm4, %v470_v4, %v485_v21  ;;  %vm505_vm6 = vc.u32 %v901_v20, %v897_v16  ;;  %v504_v43 = vadd.s32 %v897_v16, %v901_v20 }
 0x19f   :  { %v648_v34 = vpack.c.bf16 %v263_v32, %v262_v33  ;;  %v487_v24 = vsel %vm481_vm5, %v484_v22, %v486_v23  ;;  %v507_v29 = vsel %vm505_vm6, %v506_v25, %v898_v17 }
 0x1a0   :  { %v503_v27 = vmul.u32 %v496_v13, %v487_v24 }
 0x1a1   :  { %649 = vmatprep.subr.bf16.mxu1 %v648_v34 }
 0x1a2   :  { %651 = vmatpush3.bf16.msra.mxu1 %v648_v34  ;;  %v508_v31 = vadd.s32 %v507_v29, %v503_v27  ;;  %v416_v27 = vpop.permute.xlu0 %415 }
 0x1a4   :  { %v509_v32 = vadd.s32 536870912, %v508_v31 }
 0x1a5   :  { %631 = vmatmul.mubr.msk.f32.vlgmr.msra.gmra.mrb[0].mxu1 %vm158_vm0, %v577_v35 }
 0x1a6   :  { %633 = vmatprep.mubr.msk.f32.mxu1 %vm158_vm0, %v578_v36  ;;  %v510_v33 = vshrl.u32 %v509_v32, 30 }
 0x1a8   :  { %v511_v34 = vshll.u32 %v510_v33, 30  ;;  %v534_v1 = vsub.s32 4, %v510_v33 }
 0x1a9   :  { %634 = vmatmul.mubr.msk.f32.gmra.mrb[2].mxu1 %vm158_vm0, %v579_v37 }
 0x1aa   :  { %v512_v35 = vsub.s32 %v508_v31, %v511_v34  ;;  %v535_v7 = vsel %vm450_vm8, %v534_v1, %v510_v33  ;;  %v421_v33 = vpop.permute.xlu1 %420 }
 0x1ab   :  { %v537_v8 = vsel %vm914_vm9, 0, %v535_v7 }
 0x1ac   :  { %v514_v36 = vsub.s32 0, %v512_v35  ;;  %v541_v10 = vadd.s32 3, %v537_v8 }
 0x1ae   :  { %v589_v37 = vmin.u32 %v514_v36, %v512_v35  ;;  %v542_v21 = vand.u32 3, %v541_v10 }
 0x1b0   :  { %v516_v39 = vclz %v589_v37  ;;  %vm544_vm10 = vcmp.eq.s32.totalorder %v542_v21, 0  ;;  %vm547_vm11 = vcmp.eq.s32.totalorder %v542_v21, 2  ;;  %vm543_vm12 = vcmp.lt.s32.totalorder %v542_v21, 2 }
 0x1b2   :  { %v590_v40 = vadd.s32 4294967294, %v516_v39 }
 0x1b4   :  { %vm591_vm7 = vcmp.lt.s32.totalorder %v590_v40, 0 }
 0x1b5   :  { %v519_v41 = vsel %vm591_vm7, 0, %v590_v40 }
 0x1b6   :  { %v524_v42 = vsub.s32 4294967266, %v519_v41  ;;  %v520_v44 = vsub.s32 32, %v519_v41  ;;  %v521_v46 = vshll.u32 %v512_v35, %v519_v41 }
 0x1b8   :  { %v525_v45 = vadd.s32 127, %v524_v42  ;;  %v522_v47 = vshrl.u32 %v504_v43, %v520_v44 }
 0x1ba   :  { %v526_v48 = vshll.u32 %v525_v45, 23  ;;  %v523_v49 = vor.u32 %v522_v47, %v521_v46  ;;  %v440_v47 = vpop.permute.xlu0 %439 }
 0x1bc   :  { %v527_v50 = vor.u32 4788187, %v526_v48  ;;  %v530_v53 = vcvt.s32.f32 %v523_v49  ;;  %v445_v49 = vrot.slane %v440_v47, %v84_v28 }
 0x1be   :  { %v528_v52 = vand.u32 2147483647, %v527_v50 }
 0x1c0   :  { %v531_v54 = vmul.f32 %v530_v53, %v528_v52 }
 0x1c2   :  { %v532_v55 = vxor.u32 2147483648, %v531_v54 }
 0x1c4   :  { %v533_v59 = vsel %vm450_vm8, %v532_v55, %v531_v54 }
 0x1c5   :  { %v536_v0 = vsel %vm914_vm9, %v883_v38, %v533_v59 }
 0x278   :  { %v632_v60 = vpop.f32.mrb[0].mxu1 }
 0x279   :  { %v378_v61 = vadd.f32 %v632_v60, %v282_v56  ;;  %v372_v62 = vpop.f32.mrb[1].mxu1 }
 0x27a   :  { %v373_v63 = vadd.f32 %v372_v62, %v277_v57 }
 0x27b   :  { %689 = vtanh.f32 %v378_v61 }
 0x27c   :  { %691 = vtanh.f32 %v373_v63  ;;  %v635_v3 = vpop.f32.mrb[2].mxu1 }
 0x27d   :  { %v388_v4 = vadd.f32 %v635_v3, %v292_v2  ;;  %v382_v5 = vpop.f32.mrb[3].mxu1  ;;  %693 = vcosq.f32 %v536_v0 }
 0x27e   :  { %v383_v6 = vadd.f32 %v382_v5, %v287_v51  ;;  %695 = vsinq.f32 %v536_v0 }
 0x27f   :  { %697 = vtanh.f32 %v388_v4 }
 0x280   :  { %699 = vtanh.f32 %v383_v6 }
 0x285   :  { %v690_v9 = vpop.eup %689 }
 0x286   :  { %v692_v11 = vpop.eup %691  ;;  %v396_v13 = vmul.f32 %v690_v9, %v378_v61 }
 0x287   :  { %v694_v14 = vpop.eup %693  ;;  %v395_v16 = vmul.f32 %v692_v11, %v373_v63 }
 0x288   :  { %v696_v17 = vpop.eup %695  ;;  %v424_v18 = vmul.f32 %v411_v15, %v396_v13  ;;  %v548_v31 = vxor.u32 2147483648, %v694_v14 }
 0x289   :  { %v698_v19 = vpop.eup %697  ;;  %v423_v20 = vmul.f32 %v406_v12, %v395_v16  ;;  %v545_v29 = vxor.u32 2147483648, %v696_v17 }
 0x28a   :  { %v700_v22 = vpop.eup %699  ;;  %v398_v24 = vmul.f32 %v698_v19, %v388_v4  ;;  %v549_v37 = vsel %vm547_vm11, %v548_v31, %v696_v17 }
 0x28b   :  { %v427_v23 = vadd.f32 %v424_v18, %v423_v20  ;;  %v397_v25 = vmul.f32 %v700_v22, %v383_v6  ;;  %v546_v36 = vsel %vm544_vm10, %v694_v14, %v545_v29 }
 0x28c   :  { %v426_v34 = vmul.f32 %v421_v33, %v398_v24  ;;  %v550_v41 = vsel %vm543_vm12, %v546_v36, %v549_v37 }
 0x28d   :  { %v425_v32 = vmul.f32 %v416_v27, %v397_v25  ;;  %v551_v43 = vsel %vm540_vm13, nan, %v550_v41 }
 0x28e   :  { %v553_v46 = vrot.slane %v551_v43, 1 }
 0x28f   :  { %v428_v35 = vadd.f32 %v427_v23, %v425_v32 }
 0x290   :  { %v555_v52 = vmul.f32 %v553_v46, %v847_v30 }
 0x291   :  { %v429_v39 = vadd.f32 %v428_v35, %v426_v34 }
 0x293   :  { %v430_v40 = vrot.slane %v429_v39, 4 }
 0x295   :  { %v431_v42 = vadd.f32 %v430_v40, %v429_v39 }
 0x297   :  { %v432_v44 = vrot.slane %v431_v42, 2 }
 0x299   :  { %v433_v45 = vadd.f32 %v432_v44, %v431_v42 }
 0x29b   :  { %v434_v48 = vrot.slane %v433_v45, 1 }
 0x29d   :  { %v435_v50 = vadd.f32 %v434_v48, %v433_v45 }
 0x29f   :  { %v446_v53 = vadd.f32 %v445_v49, %v435_v50 }
 0x2a1   :  { %v556_v54 = vmul.f32 %v555_v52, %v446_v53 }
 0x2a3   :  { %557 = vst [vmem:[#allocation3] sm:$0x1] %v556_v54 }
 0x2a4   :  { %712 = shalt.err (!%p709_p4)
}
 0x2a5   :  { %s713_s10 = scalar_lea.hbm %s950_s7, 16 }
 0x2a6   :  { %p714_p5 = scmp.ne.s32.totalorder %s950_s7, %s713_s10  ;;  %p717_p6 = scmp.lt.u32.totalorder %s713_s10, %s950_s7 }
 0x2a8   :  { %p719_p7 = pnand %p717_p6, %p714_p5 }
 0x2aa   :  { %722 = shalt.err (!%p719_p7)
}
 0x2ab   :  { %567 = dma.vmem_to_hbm [thread:$0]  %s565_s29, 16, %s950_s7, [#allocation4]  }
 0x2ac   :  { %723 = dma.done.wait [#allocation4], 16  }
 0x2ad   :  { %724 = vsyncadd [#allocation4], 4294967280 }
 0x2ae   :  { %571 = vsyncpa [#allocation4], 1 }

</bundles_post_ra>
